<compile_context>
chip_gen: v6e
topology: v6e:2x2x1
jax: 0.10.0
libtpu: 0.0.40
codegen_flags: <defaults>
</compile_context>

<pallas_src>
import functools

import jax
import jax.numpy as jnp
from jax.experimental import pallas as pl
from jax.experimental.pallas import tpu as pltpu


def _locality_comp_kernel(pf_ref, cf_ref, cls_ref, w1_ref, w2_ref, w3_ref,
                          b_ref, g_ref, beta_ref, o_ref):
    # pf_ref / cf_ref : (1, TN, dims)         (native dtype)
    # cls_ref         : (1, 1, num_category)  (per-batch class vector)
    # w1/w2           : (dims, dims)          w3: (num_category, dims)
    # b/g/beta        : (1, dims) float32
    # o_ref           : (1, TN, dims)
    pf = pf_ref[0]          # (TN, dims)
    cf = cf_ref[0]          # (TN, dims)
    cls = cls_ref[0]        # (1, num_category)

    # Fused "concat + Linear": split the matmul across the concatenated blocks.
    y = jnp.dot(pf, w1_ref[...], preferred_element_type=jnp.float32)
    y = y + jnp.dot(cf, w2_ref[...], preferred_element_type=jnp.float32)
    y = y + jnp.dot(cls, w3_ref[...], preferred_element_type=jnp.float32)  # (1, dims) broadcast
    y = y + b_ref[...]

    # LayerNorm over last dim, f32 statistics (eps matches nn.LayerNorm default).
    mean = jnp.mean(y, axis=-1, keepdims=True)
    centered = y - mean
    var = jnp.mean(centered * centered, axis=-1, keepdims=True)
    y = centered * jax.lax.rsqrt(var + 1e-5)
    y = y * g_ref[...] + beta_ref[...]

    # ReLU
    o_ref[0] = jnp.maximum(y, 0.0).astype(o_ref.dtype)


@functools.partial(jax.jit, static_argnames=("tile_n",))
def locality_compensation(point_features, compensation_features, classes,
                          w, b, gamma, beta, *, tile_n=512):
    """point_features/compensation_features: (B, N, dims); classes: (B, num_category).

    w: (2*dims + num_category, dims)  (x @ w layout), b/gamma/beta: (dims,)
    Returns (B, N, dims).
    """
    B, N, dims = point_features.shape
    num_category = classes.shape[-1]
    in_dim = 2 * dims + num_category
    assert w.shape == (in_dim, dims)

    # Split the weight to match the (pf | cf | classes) concat order.
    w1 = w[:dims]
    w2 = w[dims:2 * dims]
    w3 = w[2 * dims:]

    # Row tile over N (classes stay per-batch -> no broadcast/concat in HBM).
    tn = min(tile_n, ((N + 7) // 8) * 8)
    n_tiles = pl.cdiv(N, tn)
    N_pad = n_tiles * tn

    pf = point_features
    cf = compensation_features
    if N_pad != N:
        pad = ((0, 0), (0, N_pad - N), (0, 0))
        pf = jnp.pad(pf, pad)
        cf = jnp.pad(cf, pad)

    cls3 = classes.reshape(B, 1, num_category)
    b2 = b.reshape(1, dims).astype(jnp.float32)
    g2 = gamma.reshape(1, dims).astype(jnp.float32)
    beta2 = beta.reshape(1, dims).astype(jnp.float32)

    M = B * N_pad
    elt = jnp.dtype(point_features.dtype).itemsize
    cost = pl.CostEstimate(
        flops=2 * M * in_dim * dims,
        transcendentals=M,  # one rsqrt per row
        bytes_accessed=(2 * M * dims + B * num_category + in_dim * dims
                        + M * dims + 3 * dims) * elt,
    )

    out = pl.pallas_call(
        _locality_comp_kernel,
        out_shape=jax.ShapeDtypeStruct((B, N_pad, dims), point_features.dtype),
        grid_spec=pltpu.PrefetchScalarGridSpec(
            num_scalar_prefetch=0,
            grid=(B, n_tiles),
            in_specs=[
                pl.BlockSpec((1, tn, dims), lambda bi, j: (bi, j, 0)),          # pf tile
                pl.BlockSpec((1, tn, dims), lambda bi, j: (bi, j, 0)),          # cf tile
                pl.BlockSpec((1, 1, num_category), lambda bi, j: (bi, 0, 0)),   # classes row
                pl.BlockSpec((dims, dims), lambda bi, j: (0, 0)),               # W[:dims]
                pl.BlockSpec((dims, dims), lambda bi, j: (0, 0)),               # W[dims:2*dims]
                pl.BlockSpec((num_category, dims), lambda bi, j: (0, 0)),       # W[2*dims:]
                pl.BlockSpec((1, dims), lambda bi, j: (0, 0)),                  # bias
                pl.BlockSpec((1, dims), lambda bi, j: (0, 0)),                  # LN gamma
                pl.BlockSpec((1, dims), lambda bi, j: (0, 0)),                  # LN beta
            ],
            out_specs=pl.BlockSpec((1, tn, dims), lambda bi, j: (bi, j, 0)),
        ),
        compiler_params=pltpu.CompilerParams(
            dimension_semantics=("parallel", "parallel"),
            vmem_limit_bytes=32 * 1024 * 1024,
        ),
        cost_estimate=cost,
    )(pf, cf, cls3, w1, w2, w3, b2, g2, beta2)

    if N_pad != N:
        out = out[:, :N, :]
    return out


def _reference(point_features, compensation_features, classes, w, b, gamma, beta):
    B, N, dims = point_features.shape
    cls_rep = jnp.broadcast_to(classes[:, None, :], (B, N, classes.shape[-1]))
    x = jnp.concatenate([point_features, compensation_features, cls_rep], axis=-1)
    y = x @ w + b
    mean = jnp.mean(y, axis=-1, keepdims=True)
    var = jnp.mean((y - mean) ** 2, axis=-1, keepdims=True)
    y = (y - mean) * jax.lax.rsqrt(var + 1e-5)
    y = y * gamma + beta
    return jnp.maximum(y, 0.0)


if __name__ == "__main__":
    dims, num_category = 32, 16
    in_dim = 2 * dims + num_category

    key = jax.random.PRNGKey(0)
    k1, k2, k3, k4, k5 = jax.random.split(key, 5)

    # nn.Linear(2*dims+num_category, dims) params (stored transposed for x @ W)
    bound = 1.0 / (in_dim ** 0.5)
    w = jax.random.uniform(k4, (in_dim, dims), jnp.float32, -bound, bound)
    b = jax.random.uniform(k5, (dims,), jnp.float32, -bound, bound)
    gamma = jnp.ones((dims,), jnp.float32)   # nn.LayerNorm default
    beta = jnp.zeros((dims,), jnp.float32)

    # --- small correctness shape ---
    B, N = 2, 8
    point_features = jax.random.normal(k1, (B, N, dims), jnp.float32)
    compensation_features = jax.random.normal(k2, (B, N, dims), jnp.float32)
    classes = jax.random.normal(k3, (B, num_category), jnp.float32)

    out = locality_compensation(point_features, compensation_features, classes,
                                w, b, gamma, beta)
    out = jax.block_until_ready(out)
    ref = _reference(point_features, compensation_features, classes, w, b, gamma, beta)
    assert out.shape == (B, N, dims)
    assert jnp.allclose(out, ref, atol=2e-5, rtol=2e-5), "mismatch vs reference (small)"

    # --- multi-tile shape (exercises grid + N padding path) ---
    B2, N2 = 2, 1040
    kk1, kk2, kk3 = jax.random.split(jax.random.PRNGKey(1), 3)
    pf2 = jax.random.normal(kk1, (B2, N2, dims), jnp.float32)
    cf2 = jax.random.normal(kk2, (B2, N2, dims), jnp.float32)
    cls2 = jax.random.normal(kk3, (B2, num_category), jnp.float32)
    out2 = jax.block_until_ready(
        locality_compensation(pf2, cf2, cls2, w, b, gamma, beta))
    ref2 = _reference(pf2, cf2, cls2, w, b, gamma, beta)
    assert out2.shape == (B2, N2, dims)
    assert jnp.allclose(out2, ref2, atol=2e-5, rtol=2e-5), "mismatch vs reference (tiled)"

    print("KERNEL_OK")
</pallas_src>

<mosaic_0001>
module attributes {stable_mosaic.version = 11 : i64} {
  func.func @_locality_comp_kernel(%arg0: i32, %arg1: i32, %arg2: memref<1x8x32xf32, #tpu.memory_space<vmem>>, %arg3: memref<1x8x32xf32, #tpu.memory_space<vmem>>, %arg4: memref<1x1x16xf32, #tpu.memory_space<vmem>>, %arg5: memref<32x32xf32, #tpu.memory_space<vmem>>, %arg6: memref<32x32xf32, #tpu.memory_space<vmem>>, %arg7: memref<16x32xf32, #tpu.memory_space<vmem>>, %arg8: memref<1x32xf32, #tpu.memory_space<vmem>>, %arg9: memref<1x32xf32, #tpu.memory_space<vmem>>, %arg10: memref<1x32xf32, #tpu.memory_space<vmem>>, %arg11: memref<1x8x32xf32, #tpu.memory_space<vmem>>) attributes {dimension_semantics = [#tpu.dimension_semantics<parallel>, #tpu.dimension_semantics<parallel>], iteration_bounds = array<i64: 2, 1>, scalar_prefetch = 0 : i64, scratch_operands = 0 : i64, tpu.core_type = #tpu.core_type<tc>, window_params = [{transform_indices = @transform_0, window_bounds = array<i64: 1, 8, 32>}, {transform_indices = @transform_1, window_bounds = array<i64: 1, 8, 32>}, {transform_indices = @transform_2, window_bounds = array<i64: 1, 1, 16>}, {pipeline_mode = #tpu.pipeline_mode<synchronous>, transform_indices = @transform_3, window_bounds = array<i64: 32, 32>}, {pipeline_mode = #tpu.pipeline_mode<synchronous>, transform_indices = @transform_4, window_bounds = array<i64: 32, 32>}, {pipeline_mode = #tpu.pipeline_mode<synchronous>, transform_indices = @transform_5, window_bounds = array<i64: 16, 32>}, {pipeline_mode = #tpu.pipeline_mode<synchronous>, transform_indices = @transform_6, window_bounds = array<i64: 1, 32>}, {pipeline_mode = #tpu.pipeline_mode<synchronous>, transform_indices = @transform_7, window_bounds = array<i64: 1, 32>}, {pipeline_mode = #tpu.pipeline_mode<synchronous>, transform_indices = @transform_8, window_bounds = array<i64: 1, 32>}, {transform_indices = @transform_9, window_bounds = array<i64: 1, 8, 32>}]} {
    %c0 = arith.constant 0 : index
    %c0_0 = arith.constant 0 : index
    %c0_1 = arith.constant 0 : index
    %0 = vector.load %arg2[%c0, %c0_0, %c0_1] : memref<1x8x32xf32, #tpu.memory_space<vmem>>, vector<1x8x32xf32>
    %1 = vector.shape_cast %0 : vector<1x8x32xf32> to vector<8x32xf32>
    %c0_2 = arith.constant 0 : index
    %c0_3 = arith.constant 0 : index
    %c0_4 = arith.constant 0 : index
    %2 = vector.load %arg3[%c0_2, %c0_3, %c0_4] : memref<1x8x32xf32, #tpu.memory_space<vmem>>, vector<1x8x32xf32>
    %3 = vector.shape_cast %2 : vector<1x8x32xf32> to vector<8x32xf32>
    %c0_5 = arith.constant 0 : index
    %c0_6 = arith.constant 0 : index
    %c0_7 = arith.constant 0 : index
    %4 = vector.load %arg4[%c0_5, %c0_6, %c0_7] : memref<1x1x16xf32, #tpu.memory_space<vmem>>, vector<1x1x16xf32>
    %5 = vector.shape_cast %4 : vector<1x1x16xf32> to vector<1x16xf32>
    %c0_8 = arith.constant 0 : index
    %c0_9 = arith.constant 0 : index
    %6 = vector.load %arg5[%c0_8, %c0_9] : memref<32x32xf32, #tpu.memory_space<vmem>>, vector<32x32xf32>
    %cst = arith.constant dense<0.000000e+00> : vector<8x32xf32>
    %7 = tpu.matmul %1, %6, %cst {dimension_numbers = #tpu.dot_dimension_numbers<[1], [0], [0], [1], [0, 0, 1, 1], [], []>} : vector<8x32xf32>, vector<32x32xf32>, vector<8x32xf32> -> vector<8x32xf32>
    %c0_10 = arith.constant 0 : index
    %c0_11 = arith.constant 0 : index
    %8 = vector.load %arg6[%c0_10, %c0_11] : memref<32x32xf32, #tpu.memory_space<vmem>>, vector<32x32xf32>
    %cst_12 = arith.constant dense<0.000000e+00> : vector<8x32xf32>
    %9 = tpu.matmul %3, %8, %cst_12 {dimension_numbers = #tpu.dot_dimension_numbers<[1], [0], [0], [1], [0, 0, 1, 1], [], []>} : vector<8x32xf32>, vector<32x32xf32>, vector<8x32xf32> -> vector<8x32xf32>
    %10 = arith.addf %7, %9 : vector<8x32xf32>
    %c0_13 = arith.constant 0 : index
    %c0_14 = arith.constant 0 : index
    %11 = vector.load %arg7[%c0_13, %c0_14] : memref<16x32xf32, #tpu.memory_space<vmem>>, vector<16x32xf32>
    %cst_15 = arith.constant dense<0.000000e+00> : vector<1x32xf32>
    %12 = tpu.matmul %5, %11, %cst_15 {dimension_numbers = #tpu.dot_dimension_numbers<[1], [0], [0], [1], [0, 0, 1, 1], [], []>} : vector<1x16xf32>, vector<16x32xf32>, vector<1x32xf32> -> vector<1x32xf32>
    %13 = vector.broadcast %12 : vector<1x32xf32> to vector<8x32xf32>
    %14 = arith.addf %10, %13 : vector<8x32xf32>
    %c0_16 = arith.constant 0 : index
    %c0_17 = arith.constant 0 : index
    %15 = vector.load %arg8[%c0_16, %c0_17] : memref<1x32xf32, #tpu.memory_space<vmem>>, vector<1x32xf32>
    %16 = vector.broadcast %15 : vector<1x32xf32> to vector<8x32xf32>
    %17 = arith.addf %14, %16 : vector<8x32xf32>
    %cst_18 = arith.constant dense<0.000000e+00> : vector<8xf32>
    %18 = vector.multi_reduction <add>, %17, %cst_18 [1] : vector<8x32xf32> to vector<8xf32>
    %19 = vector.shape_cast %18 : vector<8xf32> to vector<8x1xf32>
    %cst_19 = arith.constant 3.200000e+01 : f32
    %20 = vector.broadcast %cst_19 : f32 to vector<8x1xf32>
    %21 = arith.divf %19, %20 : vector<8x1xf32>
    %22 = vector.broadcast %21 : vector<8x1xf32> to vector<8x32xf32>
    %23 = arith.subf %17, %22 : vector<8x32xf32>
    %24 = arith.mulf %23, %23 : vector<8x32xf32>
    %cst_20 = arith.constant dense<0.000000e+00> : vector<8xf32>
    %25 = vector.multi_reduction <add>, %24, %cst_20 [1] : vector<8x32xf32> to vector<8xf32>
    %26 = vector.shape_cast %25 : vector<8xf32> to vector<8x1xf32>
    %cst_21 = arith.constant 3.200000e+01 : f32
    %27 = vector.broadcast %cst_21 : f32 to vector<8x1xf32>
    %28 = arith.divf %26, %27 : vector<8x1xf32>
    %cst_22 = arith.constant 9.99999974E-6 : f32
    %29 = vector.broadcast %cst_22 : f32 to vector<8x1xf32>
    %30 = arith.addf %28, %29 : vector<8x1xf32>
    %31 = math.rsqrt %30 : vector<8x1xf32>
    %32 = vector.broadcast %31 : vector<8x1xf32> to vector<8x32xf32>
    %33 = arith.mulf %23, %32 : vector<8x32xf32>
    %c0_23 = arith.constant 0 : index
    %c0_24 = arith.constant 0 : index
    %34 = vector.load %arg9[%c0_23, %c0_24] : memref<1x32xf32, #tpu.memory_space<vmem>>, vector<1x32xf32>
    %35 = vector.broadcast %34 : vector<1x32xf32> to vector<8x32xf32>
    %36 = arith.mulf %33, %35 : vector<8x32xf32>
    %c0_25 = arith.constant 0 : index
    %c0_26 = arith.constant 0 : index
    %37 = vector.load %arg10[%c0_25, %c0_26] : memref<1x32xf32, #tpu.memory_space<vmem>>, vector<1x32xf32>
    %38 = vector.broadcast %37 : vector<1x32xf32> to vector<8x32xf32>
    %39 = arith.addf %36, %38 : vector<8x32xf32>
    %cst_27 = arith.constant 0.000000e+00 : f32
    %40 = vector.broadcast %cst_27 : f32 to vector<8x32xf32>
    %41 = arith.maximumf %39, %40 : vector<8x32xf32>
    %c0_28 = arith.constant 0 : index
    %c0_29 = arith.constant 0 : index
    %c0_30 = arith.constant 0 : index
    %42 = vector.load %arg11[%c0_28, %c0_29, %c0_30] : memref<1x8x32xf32, #tpu.memory_space<vmem>>, vector<1x8x32xf32>
    %43 = vector.shape_cast %42 : vector<1x8x32xf32> to vector<8x32xf32>
    %44 = vector.shape_cast %41 : vector<8x32xf32> to vector<1x8x32xf32>
    tpu.vector_store %arg11[%c0_28, %c0_29, %c0_30], %44 {strides = array<i32>} : memref<1x8x32xf32, #tpu.memory_space<vmem>>, vector<1x8x32xf32>,
    return
  }
  func.func @transform_0(%arg0: i32, %arg1: i32) -> (i32, i32, i32) {
    %c0_i32 = arith.constant 0 : i32
    %c0_i32_0 = arith.constant 0 : i32
    return %arg0, %arg1, %c0_i32 : i32, i32, i32
  }
  func.func @transform_1(%arg0: i32, %arg1: i32) -> (i32, i32, i32) {
    %c0_i32 = arith.constant 0 : i32
    %c0_i32_0 = arith.constant 0 : i32
    return %arg0, %arg1, %c0_i32 : i32, i32, i32
  }
  func.func @transform_2(%arg0: i32, %arg1: i32) -> (i32, i32, i32) {
    %c0_i32 = arith.constant 0 : i32
    %c0_i32_0 = arith.constant 0 : i32
    %c0_i32_1 = arith.constant 0 : i32
    return %arg0, %c0_i32, %c0_i32_0 : i32, i32, i32
  }
  func.func @transform_3(%arg0: i32, %arg1: i32) -> (i32, i32) {
    %c0_i32 = arith.constant 0 : i32
    %c0_i32_0 = arith.constant 0 : i32
    %c0_i32_1 = arith.constant 0 : i32
    return %c0_i32, %c0_i32_0 : i32, i32
  }
  func.func @transform_4(%arg0: i32, %arg1: i32) -> (i32, i32) {
    %c0_i32 = arith.constant 0 : i32
    %c0_i32_0 = arith.constant 0 : i32
    %c0_i32_1 = arith.constant 0 : i32
    return %c0_i32, %c0_i32_0 : i32, i32
  }
  func.func @transform_5(%arg0: i32, %arg1: i32) -> (i32, i32) {
    %c0_i32 = arith.constant 0 : i32
    %c0_i32_0 = arith.constant 0 : i32
    %c0_i32_1 = arith.constant 0 : i32
    return %c0_i32, %c0_i32_0 : i32, i32
  }
  func.func @transform_6(%arg0: i32, %arg1: i32) -> (i32, i32) {
    %c0_i32 = arith.constant 0 : i32
    %c0_i32_0 = arith.constant 0 : i32
    %c0_i32_1 = arith.constant 0 : i32
    return %c0_i32, %c0_i32_0 : i32, i32
  }
  func.func @transform_7(%arg0: i32, %arg1: i32) -> (i32, i32) {
    %c0_i32 = arith.constant 0 : i32
    %c0_i32_0 = arith.constant 0 : i32
    %c0_i32_1 = arith.constant 0 : i32
    return %c0_i32, %c0_i32_0 : i32, i32
  }
  func.func @transform_8(%arg0: i32, %arg1: i32) -> (i32, i32) {
    %c0_i32 = arith.constant 0 : i32
    %c0_i32_0 = arith.constant 0 : i32
    %c0_i32_1 = arith.constant 0 : i32
    return %c0_i32, %c0_i32_0 : i32, i32
  }
  func.func @transform_9(%arg0: i32, %arg1: i32) -> (i32, i32, i32) {
    %c0_i32 = arith.constant 0 : i32
    %c0_i32_0 = arith.constant 0 : i32
    return %arg0, %arg1, %c0_i32 : i32, i32, i32
  }
}

</mosaic_0001>

<bundles_post_ra>
// kernel: locality_compensation.1
= control target key start
LH: loop header
LB: loop body
LE: loop exit
PB: predicated region body
PF: predicated region fallthrough
CT: control target
= control target key end

     0   :  { %14 = vsyncpa [#allocation3], 0  ;;  %s1190_s0 = inlined_call_operand.vmem [shape: f32[2,8,32], index: 0, kind: input, shape index: {}]   ;;  %s1191_s1 = inlined_call_operand.vmem [shape: f32[2,8,32], index: 1, kind: input, shape index: {}]   ;;  %s1192_s2 = inlined_call_operand.vmem [shape: f32[2,1,16], index: 2, kind: input, shape index: {}]   ;;  %s1193_s3 = inlined_call_operand.vmem [shape: f32[32,32], index: 3, kind: input, shape index: {}]   ;;  %s1194_s4 = inlined_call_operand.vmem [shape: f32[32,32], index: 4, kind: input, shape index: {}]   ;;  %s1195_s5 = inlined_call_operand.vmem [shape: f32[16,32], index: 5, kind: input, shape index: {}]   ;;  %s1196_s6 = inlined_call_operand.vmem [shape: f32[1,32], index: 6, kind: input, shape index: {}]   ;;  %s1197_s7 = inlined_call_operand.vmem [shape: f32[1,32], index: 7, kind: input, shape index: {}]   ;;  %s1198_s8 = inlined_call_operand.vmem [shape: f32[1,32], index: 8, kind: input, shape index: {}]   ;;  %s1199_s9 = inlined_call_operand.hbm [shape: f32[2,8,32], index: 9, kind: output, shape index: {}]  }
   0x1   :  { %16 = vsyncpa [#allocation3 + $0x1], 0  ;;  %s1034_s30 = smov 0   ;;  %s1036_s10 = smov 0  }
   0x2   :  { %s1038_s11 = smov 0   ;;  %s1040_s12 = smov 0  }
   0x3   :  { %s1042_s13 = smov 0   ;;  %s1044_s14 = smov 0  }
   0x4 LB: > { %s784_s15 = sadd.s32 4294967295, %s979_s14   ;;  %s785_s16 = sadd.s32 4294967294, %s979_s14   ;;  %s979_s14 = sphi %s1044_s14, %s22_s14   ;;  %s975_s13 = sphi %s1042_s13, %s1209_s13   ;;  %s971_s12 = sphi %s1040_s12, %s1208_s12   ;;  %s967_s11 = sphi %s1038_s11, %s1207_s11   ;;  %s963_s10 = sphi %s1036_s10, %s1206_s10   ;;  %s959_s30 = sphi %s1034_s30, %s1205_s30  }
   0x5   : > { %s34_s17 = sadd.s32 1, %s975_s13  ;;  %s251_s18 = sadd.s32 1, %s967_s11 }
   0x6   : > { %p36_p0 = scmp.ge.s32.totalorder %s34_s17, 2  ;;  %p261_p1 = scmp.ne.s32.totalorder %s967_s11, %s963_s10 }
   0x7   : > { %p262_p2 = scmp.eq.s32.totalorder %s784_s15, 1  ;;  %p267_p3 = scmp.ne.s32.totalorder %s963_s10, %s959_s30 }
   0x8   : > { %s1211_s17 = smov (%p36_p0, %s34_s17), 0  ;;  %p268_p5 = scmp.eq.s32.totalorder %s785_s16, 1 }
   0x9   : > { %1201 = sst [smem:[#allocation5_spill]] %s1211_s17  ;;  %p1074_p4 = por %p262_p2, %p261_p1 }
   0xa   : > { %s246_s20 = ssub.s32 %s975_s13, %s1211_s17  ;;  %p788_p6 = scmp.ge.s32.totalorder %s979_s14, 1 }
   0xb   : > { %p249_p7 = scmp.eq.s32.totalorder %s246_s20, 0  ;;  %p1081_p8 = por %p268_p5, %p267_p3 }
   0xc   : > { %p330_p9 = scmp.lt.s32.totalorder %s979_s14, 3 }
   0xd   : > { %s1087_s22 = scalar_select %p249_p7, %s967_s11, %s251_s18  }
   0xe   : > { %p331_p10 = pnand %p788_p6, %p330_p9 }
   0xf   : > { %p378_p11 = scmp.lt.s32.totalorder (!%p331_p10), %s971_s12, 1  ;;  %s375_s20 = sand.u32 (!%p331_p10), 1, %s963_s10  }
  0x10   : > { %334 = sbr.rel (%p331_p10) target bundleno = 557 (0x22d), region = 56  ;;  %s789_s23 = sshll.u32 (!%p331_p10), %s375_s20, 3 }
  0x11   : > { %s799_s28 = sshll.u32 (!%p331_p10), %s971_s12, 7  ;;  %s675_s24 = scalar_lea.sflag (!%p331_p10), [#allocation3], %s375_s20 }
  0x12   : > { %s983_s27 = smov (!%p331_p10), [#allocation2]  }
  0x15   : > { %v405_v0 = vld [vmem:[%s1194_s4 + $0x18] sm:$0xff]  ;;  %v981_v2 = vmov 0.0   ;;  %v404_v3 = vld [vmem:[%s1194_s4 + $0x10] sm:$0xff]  ;;  %s1103_s16 = scalar_select %p378_p11, %s971_s12, 1  ;;  %v403_v5 = vld [vmem:[%s1194_s4 + $0x8] sm:$0xff]  ;;  %vm406_vm0 = vcmask 261120   ;;  %v629_v14 = vlaneseq }
  0x16   : > { %v401_v1 = vld [vmem:[%s1193_s3 + $0x18] sm:$0xff]  ;;  %815 = vmatprep.subr.mxu0 %v981_v2  ;;  %826 = vmatprep.subr.mxu1 %v981_v2  ;;  %v400_v4 = vld [vmem:[%s1193_s3 + $0x10] sm:$0xff]  ;;  %v399_v6 = vld [vmem:[%s1193_s3 + $0x8] sm:$0xff]  ;;  %vm982_vm1 = vmmov 0   ;;  %vm555_vm2 = vcmask 130048  }
  0x17   : > { %816 = vmatpush3.msra.mxu0 %v405_v0  ;;  %827 = vmatpush3.msra.mxu1 %v401_v1  ;;  %s790_s25 = sshll.u32 %s1103_s16, 3  ;;  %v402_v7 = vld [vmem:[%s1194_s4] sm:$0xff]  ;;  %v554_v11 = vld [vmem:[%s1195_s5 + $0x8] sm:$0xff]  ;;  %s394_s29 = scalar_lea.vmem %s1192_s2, %s1103_s16  ;;  %v630_v15 = vshrl.u32 %v629_v14, 7 }
  0x18   : > { %817 = vmatprep.subr.mxu0 %v981_v2  ;;  %828 = vmatprep.subr.mxu1 %v981_v2  ;;  %s391_s15 = scalar_lea.vmem %s1191_s1, %s790_s25  ;;  %s384_s17 = scalar_lea.vmem %s1190_s0, %s790_s25  ;;  %v398_v9 = vld [vmem:[%s1193_s3] sm:$0xff] }
  0x19   : > { %818 = vmatpush3.msra.mxu0 %v404_v3  ;;  %829 = vmatpush3.msra.mxu1 %v400_v4  ;;  %v396_v8 = vld [vmem:[%s391_s15] sm:$0xff]  ;;  %v631_v19 = vsub.s32 0, %v630_v15  ;;  %s687_s16 = scalar_lea.hbm %s1199_s9, %s799_s28  ;;  %s907_s25 = sshll.u32 %s983_s27, 4  ;;  %s908_s25 = int_to_ptr.vmem [resolvable:$false] %s907_s25 }
  0x1a   : > { %819 = vmatprep.subr.mxu0 %v981_v2  ;;  %830 = vmatprep.subr.mxu1 %v981_v2  ;;  %v395_v10 = vld [vmem:[%s384_s17] sm:$0xff]  ;;  %s909_s12 = scalar_lea.vmem %s908_s25, 256 }
  0x1b   : > { %820 = vmatpush3.msra.mxu0 %v403_v5  ;;  %831 = vmatpush3.msra.mxu1 %v399_v6  ;;  %v553_v12 = vld [vmem:[%s1195_s5] sm:$0xff] }
  0x1c   : > { %821 = vmatprep.subr.mxu0 %v981_v2  ;;  %823 = vmatprep.mubr.msk.f32.mxu0 %vm982_vm1, %v981_v2  ;;  %v397_v13 = vld [vmem:[%s394_s29] sm:$0x1]  ;;  %s377_s29 = scalar_lea.vmem [#allocation2], %s789_s23 }
  0x1d   : > { %822 = vmatpush3.msra.mxu0 %v402_v7  ;;  %832 = vmatprep.subr.mxu1 %v981_v2  ;;  %v795_v25 = vld [vmem:[%s1196_s6] ss:$0 sm:$0xff]  ;;  %s689_s15 = sshll.u32 %s377_s29, 4  ;;  %s690_s15 = int_to_ptr.vmem [resolvable:$true] %s689_s15 }
  0x1e   : > { %824 = vmatmul.mubr.msk.f32.vlgmr.msra.gmra.mxu0 %vm406_vm0, %v396_v8  ;;  %833 = vmatpush3.msra.mxu1 %v398_v9  ;;  %v796_v38 = vld [vmem:[%s1197_s7] ss:$0 sm:$0xff]  ;;  %s903_s26 = scalar_lea.vmem %s690_s15, 128  ;;  %p910_p1 = scmp.lt.s32.totalorder %s690_s15, %s908_s25 }
  0x1f   : > { %834 = vmatprep.mubr.msk.f32.mxu1 %vm982_vm1, %v981_v2  ;;  %837 = vmatprep.subr.mxu0 %v981_v2  ;;  %v797_v40 = vld [vmem:[%s1198_s8] ss:$0 sm:$0xff]  ;;  %p904_p12 = scmp.ne.s32.totalorder %s690_s15, %s903_s26  ;;  %p911_p2 = scmp.lt.s32.totalorder %s909_s12, %s903_s26 }
  0x20   : > { %835 = vmatmul.mubr.msk.f32.vlgmr.msra.gmra.mxu1 %vm406_vm0, %v395_v10  ;;  %838 = vmatpush3.msra.mxu0 %v554_v11 }
  0x21   : > { %839 = vmatprep.subr.mxu0 %v981_v2  ;;  %841 = vmatprep.mubr.msk.f32.mxu0 %vm982_vm1, %v981_v2  ;;  %p905_p13 = pnand %p904_p12, %p1074_p4  ;;  %p912_p3 = por %p911_p2, %p910_p1 }
  0x22   : > { %840 = vmatpush3.msra.mxu0 %v553_v12 }
  0x23   : > { %842 = vmatmul.mubr.msk.f32.vlgmr.msra.gmra.mxu0 %vm555_vm2, %v397_v13  ;;  %p906_p0 = pneg %p905_p13 }
  0x25   : > { %p913_p5 = pnand %p912_p3, %p906_p0 }
  0xde   : > { %v476_v16 = vpop.f32.mrf.mxu0 }
  0xe0   : > { %v549_v17 = vpop.f32.mrf.mxu1  ;;  %v825_v18 = vpop.f32.mrf.mxu0 }
  0xe1   : > { %v550_v22 = vadd.f32 %v549_v17, %v476_v16 }
  0xe2   : > { %v836_v20 = vpop.f32.mrf.mxu1 }
  0xe3   : > { %v625_v21 = vpop.f32.mrf.mxu0 }
  0xe4   : > { %v632_v23 = vrot.slane %v625_v21, %v631_v19 }
  0xe5   : > { %v843_v24 = vpop.f32.mrf.mxu0 }
  0xe6   : > { %v633_v26 = vadd.f32 %v632_v23, %v550_v22 }
  0xe8   : > { %v641_v27 = vadd.f32 %v795_v25, %v633_v26 }
  0xea   : > { %v642_v28 = vsel %vm406_vm0, %v641_v27, 0.0 }
  0xeb   : > { %643 = vadd.xlane.f32.xlu0 %v642_v28 }
 0x174   : > { %v644_v29 = vpop.xlane.xlu0 %643 }
 0x175   : > { %v646_v30 = vmul.f32 0.03125, %v644_v29 }
 0x177   : > { %v647_v31 = vsub.f32 %v641_v27, %v646_v30 }
 0x179   : > { %v648_v32 = vmul.f32 %v647_v31, %v647_v31 }
 0x17b   : > { %v649_v33 = vsel %vm406_vm0, %v648_v32, 0.0 }
 0x17c   : > { %650 = vadd.xlane.f32.xlu0 %v649_v33 }
 0x205   : > { %v651_v34 = vpop.xlane.xlu0 %650 }
 0x206   : > { %v652_v35 = vmul.f32 0.03125, %v651_v34 }
 0x208   : > { %v653_v36 = vadd.f32 1e-05, %v652_v35 }
 0x20a   : > { %901 = vrsqrt.f32 %v653_v36 }
 0x217   : > { %v902_v37 = vpop.eup %901 }
 0x218   : > { %v655_v39 = vmul.f32 %v902_v37, %v647_v31 }
 0x21a   : > { %v663_v41 = vmul.f32 %v796_v38, %v655_v39 }
 0x21c   : > { %v671_v42 = vadd.f32 %v797_v40, %v663_v41 }
 0x21e   : > { %v672_v43 = vmax.f32 %v671_v42, 0.0 }
 0x220   : > { %673 = vst.msk [vmem:[%s377_s29] sm:$0xff] %vm406_vm0, %v672_v43 }
 0x221   : > { %916 = shalt.err (!%p913_p5)
}
 0x222   : > { %s917_s23 = scalar_lea.hbm %s687_s16, 128  ;;  %s921_s29 = scalar_lea.hbm %s1199_s9, 256 }
 0x223   : > { %p918_p6 = scmp.ne.s32.totalorder %s687_s16, %s917_s23  ;;  %p922_p10 = scmp.lt.s32.totalorder %s687_s16, %s1199_s9 }
 0x224   : > { %p923_p11 = scmp.lt.s32.totalorder %s921_s29, %s917_s23 }
 0x225   : > { %p919_p7 = pnand %p918_p6, %p1074_p4 }
 0x226   : > { %p924_p12 = por %p923_p11, %p922_p10 }
 0x227   : > { %p920_p9 = pneg %p919_p7 }
 0x229   : > { %p925_p13 = pnand %p924_p12, %p920_p9 }
 0x22b   : > { %928 = shalt.err (!%p925_p13)
}
 0x22c   : > { %844 = dma.vmem_to_hbm [thread:$0]  (%p1074_p4), %s690_s15, 128, %s687_s16, %s675_s24  }
 0x22d PF: > { %p850_p0 = scmp.ge.s32.totalorder %s979_s14, 2  ;;  %s701_s26 = sand.u32 1, %s959_s30  }
 0x22e   : > { %s702_s27 = scalar_lea.sflag [#allocation3], %s701_s26 }
 0x22f   : > { %p847_p1 = pnand %p850_p0, %p1081_p8 }
 0x231   : > { %p848_p2 = pneg %p847_p1 }
 0x233   : > { %954 = dma.done.wait (%p848_p2), %s702_s27, 128  }
 0x234   : > { %956 = vsyncadd (%p848_p2), %s702_s27, 4294967168  ;;  %s22_s14 = sadd.s32 1, %s979_s14   ;;  %s1204_s19 = sld [smem:[#allocation5_spill]] }
 0x235   : > { %p19_p3 = scmp.ge.s32.totalorder %s22_s14, 4   ;;  %s1205_s30 = smov %s963_s10 }
 0x236   : > { %s1206_s10 = smov %s967_s11  ;;  %s1207_s11 = smov %s1087_s22 }
 0x237   : > { %s1208_s12 = smov %s975_s13  ;;  %21 = sbr.rel (!%p19_p3) target bundleno = 4 (0x4), region = 97 }
 0x23a   : > { %s1209_s13 = smov %s1204_s19 }
 0x23c   :  { %707 = vsyncpa [#allocation3], 1 }
 0x23d   :  { %709 = vsyncpa [#allocation3 + $0x1], 1 }

</bundles_post_ra>
